<compile_context>
chip_gen: v7x
topology: tpu7x:2x2x1
jax: 0.10.0
libtpu: 0.0.40
codegen_flags: <defaults>
</compile_context>

<pallas_src>
import jax
import jax.numpy as jnp
from jax.experimental import pallas as pl
from jax.experimental.pallas import tpu as pltpu


def _round_up(n, m):
    return ((n + m - 1) // m) * m


def classifier_kernel(x_ref, w1_ref, b1_ref, w2_ref, b2_ref, wc_ref, bc_ref, o_ref):
    # TODO(synk): training-mode dropout (stochastic masking via pltpu.prng_*) not
    # reproduced; this implements eval-mode (dropout == identity) semantics.
    x = x_ref[...]

    # l1 + tanh   (bf16 MXU operands, f32 accumulation, f32 elementwise/EUP)
    h1 = jnp.dot(x.astype(jnp.bfloat16), w1_ref[...],
                 preferred_element_type=jnp.float32) + b1_ref[...]
    h1 = jnp.tanh(h1)

    # l2 + tanh
    h2 = jnp.dot(h1.astype(jnp.bfloat16), w2_ref[...],
                 preferred_element_type=jnp.float32) + b2_ref[...]
    h2 = jnp.tanh(h2)

    # classifier head at natural width (nclasses); masked vst is cheap next to
    # the 16x smaller HBM writeback.
    out = jnp.dot(h2.astype(jnp.bfloat16), wc_ref[...],
                  preferred_element_type=jnp.float32) + bc_ref[...]
    o_ref[...] = out.astype(o_ref.dtype)


def _pick_tile_b(B, tile_b_max):
    """Batch tile: single tile for small B; MXU-row (256) aligned for large B,
    capped so large batches keep >=2 grid steps (v7x has 2 TensorCores)."""
    if B <= 256:
        return _round_up(max(B, 8), 8)
    t = min(tile_b_max, _round_up(B, 256))
    t = max(256, (t // 256) * 256)
    while t > 256 and pl.cdiv(B, t) < 2:
        t -= 256
    return t


def classifier_forward(x, params, *, tile_b_max=4096):
    """x: [B, D] float32.  params: dict of pre-transposed (in, out) weights,
    already stored as bf16 (weights) / f32 (biases) -- no per-call prep."""
    B, D = x.shape
    w1, b1, w2, b2, wc, bc = (params["w1"], params["b1"], params["w2"],
                              params["b2"], params["wc"], params["bc"])
    nclasses = wc.shape[1]

    tile_b = _pick_tile_b(B, tile_b_max)
    b_pad = _round_up(B, tile_b)
    x_p = jnp.pad(x, ((0, b_pad - B), (0, 0))) if b_pad != B else x

    grid = (b_pad // tile_b,)

    cost = pl.CostEstimate(
        flops=2 * b_pad * D * (2 * D + nclasses),
        transcendentals=2 * b_pad * D,
        bytes_accessed=(x_p.size * 4
                        + (w1.size + w2.size + wc.size) * 2
                        + (b1.size + b2.size + bc.size) * 4
                        + b_pad * nclasses * 4),
    )

    # VMEM budget (bytes): double-buffered x + out tiles plus weights, with
    # generous headroom; tiny vs. even v7x's 64 MiB physical.
    vmem_bytes = min(
        32 * 1024 * 1024,
        max(4 * 1024 * 1024,
            8 * tile_b * (D + nclasses) * 4
            + 4 * (w1.size + w2.size + wc.size) * 2),
    )

    def _call(single_buffer_weights):
        spec_kw = dict(pipeline_mode=pl.Buffered(1)) if single_buffer_weights else {}

        def const_spec(shape):
            # Grid-invariant operand (same block every step).
            return pl.BlockSpec(shape, lambda i: (0, 0), **spec_kw)

        return pl.pallas_call(
            classifier_kernel,
            out_shape=jax.ShapeDtypeStruct((b_pad, nclasses), jnp.float32),
            grid_spec=pltpu.PrefetchScalarGridSpec(
                num_scalar_prefetch=0,
                grid=grid,
                in_specs=[
                    pl.BlockSpec((tile_b, D), lambda i: (i, 0)),  # x tile over batch
                    const_spec((D, D)),          # W1 (in, out), bf16
                    const_spec((1, D)),          # b1, f32
                    const_spec((D, D)),          # W2, bf16
                    const_spec((1, D)),          # b2, f32
                    const_spec((D, nclasses)),   # Wc, bf16
                    const_spec((1, nclasses)),   # bc, f32
                ],
                out_specs=pl.BlockSpec((tile_b, nclasses), lambda i: (i, 0)),
            ),
            compiler_params=pltpu.CompilerParams(
                dimension_semantics=("parallel",),
                vmem_limit_bytes=vmem_bytes),
            cost_estimate=cost,
        )(x_p, w1, b1, w2, b2, wc, bc)

    try:
        out = _call(single_buffer_weights=True)
    except (TypeError, ValueError, NotImplementedError):
        # Narrow fallback: only buffering-related rejections re-trace with
        # default double-buffering; unrelated errors re-surface from this call.
        out = _call(single_buffer_weights=False)

    return out[:B, :]


def init_params(key, inp_size, nclasses):
    """Deterministic PyTorch-style init (uniform +-1/sqrt(fan_in)).

    Weights are stored transposed relative to nn.Linear, shape (in, out), and
    already cast to bf16 (MXU operand dtype) so the forward path does no prep.
    Biases stay f32."""
    ks = jax.random.split(key, 6)
    bound = 1.0 / jnp.sqrt(inp_size)

    def u(k, shape, b):
        return jax.random.uniform(k, shape, jnp.float32, minval=-b, maxval=b)

    return {
        "w1": u(ks[0], (inp_size, inp_size), bound).astype(jnp.bfloat16),
        "b1": u(ks[1], (1, inp_size), bound),
        "w2": u(ks[2], (inp_size, inp_size), bound).astype(jnp.bfloat16),
        "b2": u(ks[3], (1, inp_size), bound),
        "wc": u(ks[4], (inp_size, nclasses), bound).astype(jnp.bfloat16),
        "bc": u(ks[5], (1, nclasses), bound),
    }


def reference_forward(x, p):
    """Pure-JAX reference matching the kernel's bf16-MXU / f32-accumulate math."""
    def mm(a, w):
        return jnp.dot(a.astype(jnp.bfloat16), w.astype(jnp.bfloat16),
                       preferred_element_type=jnp.float32)

    h = jnp.tanh(mm(x, p["w1"]) + p["b1"])
    h = jnp.tanh(mm(h, p["w2"]) + p["b2"])
    return mm(h, p["wc"]) + p["bc"]


if __name__ == "__main__":
    inp_size = 32
    nclasses = 8
    batch = 16

    key = jax.random.PRNGKey(0)
    k_x, k_p = jax.random.split(key)

    x = jax.random.normal(k_x, (batch, inp_size), dtype=jnp.float32)
    params = init_params(k_p, inp_size, nclasses)

    out = classifier_forward(x, params)
    out = jax.block_until_ready(out)

    ref = reference_forward(x, params)
    assert out.shape == (batch, nclasses)
    assert jnp.allclose(out, ref, atol=2e-2, rtol=2e-2), "mismatch vs JAX reference"

    print("KERNEL_OK")
</pallas_src>

<mosaic_0001>
module attributes {stable_mosaic.version = 11 : i64} {
  func.func @classifier_kernel(%arg0: i32, %arg1: memref<16x32xf32, #tpu.memory_space<vmem>>, %arg2: memref<32x32xbf16, #tpu.memory_space<vmem>>, %arg3: memref<1x32xf32, #tpu.memory_space<vmem>>, %arg4: memref<32x32xbf16, #tpu.memory_space<vmem>>, %arg5: memref<1x32xf32, #tpu.memory_space<vmem>>, %arg6: memref<32x8xbf16, #tpu.memory_space<vmem>>, %arg7: memref<1x8xf32, #tpu.memory_space<vmem>>, %arg8: memref<16x8xf32, #tpu.memory_space<vmem>>) attributes {dimension_semantics = [#tpu.dimension_semantics<parallel>], iteration_bounds = array<i64: 1>, scalar_prefetch = 0 : i64, scratch_operands = 0 : i64, tpu.core_type = #tpu.core_type<tc>, window_params = [{transform_indices = @transform_0, window_bounds = array<i64: 16, 32>}, {pipeline_mode = #tpu.pipeline_mode<synchronous>, transform_indices = @transform_1, window_bounds = array<i64: 32, 32>}, {pipeline_mode = #tpu.pipeline_mode<synchronous>, transform_indices = @transform_2, window_bounds = array<i64: 1, 32>}, {pipeline_mode = #tpu.pipeline_mode<synchronous>, transform_indices = @transform_3, window_bounds = array<i64: 32, 32>}, {pipeline_mode = #tpu.pipeline_mode<synchronous>, transform_indices = @transform_4, window_bounds = array<i64: 1, 32>}, {pipeline_mode = #tpu.pipeline_mode<synchronous>, transform_indices = @transform_5, window_bounds = array<i64: 32, 8>}, {pipeline_mode = #tpu.pipeline_mode<synchronous>, transform_indices = @transform_6, window_bounds = array<i64: 1, 8>}, {transform_indices = @transform_7, window_bounds = array<i64: 16, 8>}]} {
    %c0 = arith.constant 0 : index
    %c0_0 = arith.constant 0 : index
    %0 = vector.load %arg1[%c0, %c0_0] : memref<16x32xf32, #tpu.memory_space<vmem>>, vector<16x32xf32>
    %1 = arith.truncf %0 : vector<16x32xf32> to vector<16x32xbf16>
    %c0_1 = arith.constant 0 : index
    %c0_2 = arith.constant 0 : index
    %2 = vector.load %arg2[%c0_1, %c0_2] : memref<32x32xbf16, #tpu.memory_space<vmem>>, vector<32x32xbf16>
    %cst = arith.constant dense<0.000000e+00> : vector<16x32xf32>
    %3 = tpu.matmul %1, %2, %cst {dimension_numbers = #tpu.dot_dimension_numbers<[1], [0], [0], [1], [0, 0, 1, 1], [], []>} : vector<16x32xbf16>, vector<32x32xbf16>, vector<16x32xf32> -> vector<16x32xf32>
    %c0_3 = arith.constant 0 : index
    %c0_4 = arith.constant 0 : index
    %4 = vector.load %arg3[%c0_3, %c0_4] : memref<1x32xf32, #tpu.memory_space<vmem>>, vector<1x32xf32>
    %5 = vector.broadcast %4 : vector<1x32xf32> to vector<16x32xf32>
    %6 = arith.addf %3, %5 : vector<16x32xf32>
    %7 = math.tanh %6 : vector<16x32xf32>
    %8 = arith.truncf %7 : vector<16x32xf32> to vector<16x32xbf16>
    %c0_5 = arith.constant 0 : index
    %c0_6 = arith.constant 0 : index
    %9 = vector.load %arg4[%c0_5, %c0_6] : memref<32x32xbf16, #tpu.memory_space<vmem>>, vector<32x32xbf16>
    %cst_7 = arith.constant dense<0.000000e+00> : vector<16x32xf32>
    %10 = tpu.matmul %8, %9, %cst_7 {dimension_numbers = #tpu.dot_dimension_numbers<[1], [0], [0], [1], [0, 0, 1, 1], [], []>} : vector<16x32xbf16>, vector<32x32xbf16>, vector<16x32xf32> -> vector<16x32xf32>
    %c0_8 = arith.constant 0 : index
    %c0_9 = arith.constant 0 : index
    %11 = vector.load %arg5[%c0_8, %c0_9] : memref<1x32xf32, #tpu.memory_space<vmem>>, vector<1x32xf32>
    %12 = vector.broadcast %11 : vector<1x32xf32> to vector<16x32xf32>
    %13 = arith.addf %10, %12 : vector<16x32xf32>
    %14 = math.tanh %13 : vector<16x32xf32>
    %15 = arith.truncf %14 : vector<16x32xf32> to vector<16x32xbf16>
    %c0_10 = arith.constant 0 : index
    %c0_11 = arith.constant 0 : index
    %16 = vector.load %arg6[%c0_10, %c0_11] : memref<32x8xbf16, #tpu.memory_space<vmem>>, vector<32x8xbf16>
    %cst_12 = arith.constant dense<0.000000e+00> : vector<16x8xf32>
    %17 = tpu.matmul %15, %16, %cst_12 {dimension_numbers = #tpu.dot_dimension_numbers<[1], [0], [0], [1], [0, 0, 1, 1], [], []>} : vector<16x32xbf16>, vector<32x8xbf16>, vector<16x8xf32> -> vector<16x8xf32>
    %c0_13 = arith.constant 0 : index
    %c0_14 = arith.constant 0 : index
    %18 = vector.load %arg7[%c0_13, %c0_14] : memref<1x8xf32, #tpu.memory_space<vmem>>, vector<1x8xf32>
    %19 = vector.broadcast %18 : vector<1x8xf32> to vector<16x8xf32>
    %20 = arith.addf %17, %19 : vector<16x8xf32>
    %c0_15 = arith.constant 0 : index
    %c0_16 = arith.constant 0 : index
    %21 = vector.load %arg8[%c0_15, %c0_16] : memref<16x8xf32, #tpu.memory_space<vmem>>, vector<16x8xf32>
    tpu.vector_store %arg8[%c0_15, %c0_16], %20 {strides = array<i32>} : memref<16x8xf32, #tpu.memory_space<vmem>>, vector<16x8xf32>,
    return
  }
  func.func @transform_0(%arg0: i32) -> (i32, i32) {
    %c0_i32 = arith.constant 0 : i32
    %c0_i32_0 = arith.constant 0 : i32
    return %arg0, %c0_i32 : i32, i32
  }
  func.func @transform_1(%arg0: i32) -> (i32, i32) {
    %c0_i32 = arith.constant 0 : i32
    %c0_i32_0 = arith.constant 0 : i32
    %c0_i32_1 = arith.constant 0 : i32
    return %c0_i32, %c0_i32_0 : i32, i32
  }
  func.func @transform_2(%arg0: i32) -> (i32, i32) {
    %c0_i32 = arith.constant 0 : i32
    %c0_i32_0 = arith.constant 0 : i32
    %c0_i32_1 = arith.constant 0 : i32
    return %c0_i32, %c0_i32_0 : i32, i32
  }
  func.func @transform_3(%arg0: i32) -> (i32, i32) {
    %c0_i32 = arith.constant 0 : i32
    %c0_i32_0 = arith.constant 0 : i32
    %c0_i32_1 = arith.constant 0 : i32
    return %c0_i32, %c0_i32_0 : i32, i32
  }
  func.func @transform_4(%arg0: i32) -> (i32, i32) {
    %c0_i32 = arith.constant 0 : i32
    %c0_i32_0 = arith.constant 0 : i32
    %c0_i32_1 = arith.constant 0 : i32
    return %c0_i32, %c0_i32_0 : i32, i32
  }
  func.func @transform_5(%arg0: i32) -> (i32, i32) {
    %c0_i32 = arith.constant 0 : i32
    %c0_i32_0 = arith.constant 0 : i32
    %c0_i32_1 = arith.constant 0 : i32
    return %c0_i32, %c0_i32_0 : i32, i32
  }
  func.func @transform_6(%arg0: i32) -> (i32, i32) {
    %c0_i32 = arith.constant 0 : i32
    %c0_i32_0 = arith.constant 0 : i32
    %c0_i32_1 = arith.constant 0 : i32
    return %c0_i32, %c0_i32_0 : i32, i32
  }
  func.func @transform_7(%arg0: i32) -> (i32, i32) {
    %c0_i32 = arith.constant 0 : i32
    %c0_i32_0 = arith.constant 0 : i32
    return %arg0, %c0_i32 : i32, i32
  }
}

</mosaic_0001>

<bundles_post_ra>
// kernel: tpu_custom_call.1
= control target key start
LH: loop header
LB: loop body
LE: loop exit
PB: predicated region body
PF: predicated region fallthrough
CT: control target
= control target key end

     0   :  { %12 = vsyncpa [#allocation3], 0  ;;  %s488_s0 = inlined_call_operand.vmem [shape: f32[16,32], index: 0, kind: input, shape index: {}]   ;;  %s489_s1 = inlined_call_operand.hbm [shape: bf16[32,32], index: 1, kind: input, shape index: {}]   ;;  %s490_s2 = inlined_call_operand.vmem [shape: f32[1,32], index: 2, kind: input, shape index: {}]   ;;  %s491_s3 = inlined_call_operand.hbm [shape: bf16[32,32], index: 3, kind: input, shape index: {}]   ;;  %s492_s4 = inlined_call_operand.vmem [shape: f32[1,32], index: 4, kind: input, shape index: {}]   ;;  %s493_s5 = inlined_call_operand.vmem [shape: bf16[32,8], index: 5, kind: input, shape index: {}]   ;;  %s494_s6 = inlined_call_operand.vmem [shape: f32[1,8], index: 6, kind: input, shape index: {}]   ;;  %s495_s7 = inlined_call_operand.vmem [shape: f32[16,8], index: 7, kind: output, shape index: {}]  }
   0x1   :  { %13 = vsyncpa [#allocation5], 0  ;;  %s388_s24 = smov [#allocation2]   ;;  %s340_s28 = scalar_lea.hbm %s489_s1, 256 }
   0x2   :  { %s21_s25 = sshll.u32 %s388_s24, 4  ;;  %p341_p0 = scmp.ne.s32.totalorder %s489_s1, %s340_s28  ;;  %s22_s25 = int_to_ptr.vmem [resolvable:$true] %s21_s25 }
   0x3   :  { %p344_p1 = scmp.lt.u32.totalorder %s340_s28, %s489_s1 }
   0x5   :  { %p346_p2 = pnand %p344_p1, %p341_p0 }
   0x7   :  { %349 = shalt.err (!%p346_p2)
}
   0x8   :  { %s350_s10 = scalar_lea.vmem %s22_s25, 256  ;;  %p355_p4 = scmp.lt.s32.totalorder %s22_s25, %s22_s25 }
   0x9   :  { %p351_p3 = scmp.ne.s32.totalorder %s22_s25, %s350_s10  ;;  %p356_p5 = scmp.lt.s32.totalorder %s350_s10, %s350_s10 }
   0xb   :  { %p357_p6 = por %p356_p5, %p355_p4 }
   0xd   :  { %p358_p7 = pnand %p357_p6, %p351_p3 }
   0xf   :  { %361 = shalt.err (!%p358_p7)
}
  0x10   :  { %s389_s11 = smov 64   ;;  %s390_s12 = smov 4  }
  0x11   :  { %27 = dma.hbm_to_vmem [thread:$0]  %s489_s1, 256, %s22_s25, [#allocation3], %s389_s11, %s389_s11, %s390_s12  }
  0x12   :  { %s391_s15 = smov [#allocation4]   ;;  %s362_s19 = scalar_lea.hbm %s491_s3, 256 }
  0x13   :  { %s35_s16 = sshll.u32 %s391_s15, 4  ;;  %p363_p8 = scmp.ne.s32.totalorder %s491_s3, %s362_s19  ;;  %s36_s16 = int_to_ptr.vmem [resolvable:$true] %s35_s16 }
  0x14   :  { %p366_p9 = scmp.lt.u32.totalorder %s362_s19, %s491_s3 }
  0x16   :  { %p368_p10 = pnand %p366_p9, %p363_p8 }
  0x18   :  { %371 = shalt.err (!%p368_p10)
}
  0x19   :  { %s372_s24 = scalar_lea.vmem %s36_s16, 256  ;;  %p377_p12 = scmp.lt.s32.totalorder %s36_s16, %s36_s16 }
  0x1a   :  { %p373_p11 = scmp.ne.s32.totalorder %s36_s16, %s372_s24  ;;  %p378_p13 = scmp.lt.s32.totalorder %s372_s24, %s372_s24 }
  0x1c   :  { %p379_p0 = por %p378_p13, %p377_p12 }
  0x1e   :  { %p380_p1 = pnand %p379_p0, %p373_p11 }
  0x20   :  { %383 = shalt.err (!%p380_p1)
}
  0x21   :  { %41 = dma.hbm_to_vmem [thread:$0]  %s491_s3, 256, %s36_s16, [#allocation5], %s389_s11, %s389_s11, %s390_s12  }
  0x22   :  { %384 = dma.done.wait [#allocation3], 256  }
  0x23   :  { %385 = vsyncadd [#allocation3], 4294967040 }
  0x24   :  { %386 = dma.done.wait [#allocation5], 256  }
  0x25   :  { %387 = vsyncadd [#allocation5], 4294967040  ;;  %v392_v0 = vmov 0.0   ;;  %vm393_vm0 = vmmov 0   ;;  %v326_v1 = vld [vmem:[#allocation2] sm:$0xff]   ;;  %v327_v2 = vld [vmem:[#allocation2 + $0x8] sm:$0xff]  }
  0x26   :  { %296 = vmatprep.subr.bf16.mxu0 %v392_v0  ;;  %300 = vmatprep.mubr.msk.bf16.mxu0 %vm393_vm0, %v392_v0  ;;  %v55_v3 = vld [vmem:[%s488_s0] sm:$0xff]  ;;  %v56_v4 = vld [vmem:[%s488_s0 + $0x8] sm:$0xff]  ;;  %vm81_vm1 = vcmask 261120   ;;  %v328_v6 = vld [vmem:[#allocation4] sm:$0xff]   ;;  %vm266_vm2 = vcmask 64512  }
  0x27   :  { %304 = vmatprep.subr.bf16.mxu1 %v392_v0  ;;  %308 = vmatprep.mubr.msk.bf16.mxu1 %vm393_vm0, %v392_v0  ;;  %v57_v5 = vpack.c.bf16 %v56_v4, %v55_v3  ;;  %v329_v7 = vld [vmem:[#allocation4 + $0x8] sm:$0xff]   ;;  %v275_v8 = vld [vmem:[%s490_s2] ss:$0 sm:$0xff]  ;;  %v331_v19 = vld [vmem:[%s493_s5 + $0x8] sm:$0xff]  }
  0x28   :  { %297 = vmatpush3.bf16.msra.mxu0 %v326_v1  ;;  %305 = vmatpush3.bf16.msra.mxu1 %v328_v6  ;;  %v330_v18 = vld [vmem:[%s493_s5] sm:$0xff]  }
  0x29   :  { %298 = vmatprep.subr.bf16.mxu0 %v392_v0  ;;  %306 = vmatprep.subr.bf16.mxu1 %v392_v0  ;;  %v279_v20 = vld [vmem:[%s492_s4] ss:$0 sm:$0xff] }
  0x2a   :  { %v283_v30 = vld [vmem:[%s494_s6] ss:$0 sm:$0xff] }
  0x2c   :  { %299 = vmatpush3.bf16.msra.mxu0 %v327_v2  ;;  %307 = vmatpush3.bf16.msra.mxu1 %v329_v7 }
  0x2d   :  { %312 = vmatprep.subr.bf16.mxu0 %v392_v0 }
  0x2f   :  { %301 = vmatmul.mubr.msk.bf16.vlgmr.msra.gmra.mrb[0].mxu0 %vm81_vm1, %v57_v5 }
  0x30   :  { %316 = vmatprep.mubr.msk.bf16.mxu0 %vm393_vm0, %v392_v0  ;;  %313 = vmatpush3.bf16.msra.mxu0 %v330_v18 }
  0x31   :  { %314 = vmatprep.subr.bf16.mxu0 %v392_v0 }
  0x34   :  { %315 = vmatpush3.bf16.msra.mxu0 %v331_v19 }
 0x102   :  { %v119_v9 = vpop.f32.mrb[0].mxu0 }
 0x103   :  { %v120_v10 = vadd.f32 %v275_v8, %v119_v9  ;;  %v302_v11 = vpop.f32.mrb[1].mxu0 }
 0x104   :  { %v122_v12 = vpop.f32.mrb[2].mxu0 }
 0x105   :  { %v123_v13 = vadd.f32 %v275_v8, %v122_v12  ;;  %v303_v14 = vpop.f32.mrb[3].mxu0  ;;  %332 = vtanh.f32 %v120_v10 }
 0x107   :  { %334 = vtanh.f32 %v123_v13 }
 0x10f   :  { %v333_v15 = vpop.eup %332 }
 0x111   :  { %v335_v16 = vpop.eup %334 }
 0x112   :  { %v128_v17 = vpack.c.bf16 %v335_v16, %v333_v15 }
 0x114   :  { %309 = vmatmul.mubr.msk.bf16.vlgmr.msra.gmra.mrb[0].mxu1 %vm81_vm1, %v128_v17 }
 0x1e7   :  { %v189_v21 = vpop.f32.mrb[0].mxu1 }
 0x1e8   :  { %v190_v22 = vadd.f32 %v279_v20, %v189_v21  ;;  %v310_v23 = vpop.f32.mrb[1].mxu1 }
 0x1e9   :  { %v192_v24 = vpop.f32.mrb[2].mxu1 }
 0x1ea   :  { %v193_v25 = vadd.f32 %v279_v20, %v192_v24  ;;  %v311_v26 = vpop.f32.mrb[3].mxu1  ;;  %336 = vtanh.f32 %v190_v22 }
 0x1ec   :  { %338 = vtanh.f32 %v193_v25 }
 0x1f4   :  { %v337_v27 = vpop.eup %336 }
 0x1f6   :  { %v339_v28 = vpop.eup %338 }
 0x1f7   :  { %v198_v29 = vpack.c.bf16 %v339_v28, %v337_v27 }
 0x1f9   :  { %317 = vmatmul.mubr.msk.bf16.vlgmr.msra.gmra.mrb[4].mxu0 %vm81_vm1, %v198_v29 }
 0x2cc   :  { %v259_v31 = vpop.f32.mrb[4].mxu0 }
 0x2cd   :  { %v260_v32 = vadd.f32 %v283_v30, %v259_v31  ;;  %v318_v33 = vpop.f32.mrb[5].mxu0 }
 0x2ce   :  { %v262_v34 = vpop.f32.mrb[6].mxu0 }
 0x2cf   :  { %267 = vst.msk [vmem:[%s495_s7] sm:$0xff] %vm266_vm2, %v260_v32  ;;  %v263_v35 = vadd.f32 %v283_v30, %v262_v34  ;;  %v319_v36 = vpop.f32.mrb[7].mxu0 }
 0x2d1   :  { %268 = vst.msk [vmem:[%s495_s7 + $0x8] sm:$0xff] %vm266_vm2, %v263_v35 }
 0x2d2   :  { %273 = vsyncpa [#allocation3], 1 }
 0x2d3   :  { %274 = vsyncpa [#allocation5], 1 }

</bundles_post_ra>
